<compile_context>
chip_gen: v5e
topology: v5e:2x2
jax: 0.10.0
libtpu: 0.0.40
codegen_flags: <defaults>
</compile_context>

<pallas_src>
import jax
import jax.numpy as jnp
from jax.experimental import pallas as pl
from jax.experimental.pallas import tpu as pltpu

_F32 = jnp.float32
_EPS = 1e-12


def _round_up(x, m):
    return ((x + m - 1) // m) * m


# ----------------------------- Pallas kernel --------------------------------

def _l2_normalize_f32(x):
    # rsqrt rides the EUP slot; eps avoids Inf/NaN on zero rows.
    # TODO(synk): torch F.normalize clamps the norm instead of adding eps to
    # the sum of squares; the difference is negligible at these magnitudes.
    inv = jax.lax.rsqrt(jnp.sum(x * x, axis=-1, keepdims=True) + _EPS)
    return x * inv


def _quick_gelu(x):
    # OpenAI-CLIP QuickGELU: x * sigmoid(1.702 x); sigmoid lowers to the EUP.
    return x * jax.nn.sigmoid(1.702 * x)


def _fused_clip_kernel(scale_ref,
                       patches_ref, w_patch_ref, b_patch_ref,
                       w_vmlp_ref, b_vmlp_ref, pool_ref,
                       w_vproj_ref, b_vproj_ref,
                       txt_ref, w_tmlp_ref, b_tmlp_ref,
                       w_tproj_ref, b_tproj_ref,
                       img_feat_ref, txt_feat_ref, logits_ref,
                       txt_pad_ref):
    bf16 = jnp.bfloat16

    # ------------------------------ image tower -----------------------------
    # bf16 operands straight into the MXU, f32 accumulate + f32 bias/epilogue.
    h = jnp.dot(patches_ref[...], w_patch_ref[...],
                preferred_element_type=_F32) + b_patch_ref[...]
    h = jnp.dot(h.astype(bf16), w_vmlp_ref[...],
                preferred_element_type=_F32) + b_vmlp_ref[...]
    h = _quick_gelu(h).astype(bf16)
    # mean-pool over patches: MXU matmul against an exact 0/1 block-diagonal
    # sum map, 1/P applied in the f32 epilogue (no bf16 1/P rounding bias).
    # TODO(synk): at production P (~196-256, B>=64) replace with a
    # reshape(B, P, W) + mean over axis 1 (XLU sublane reduce) to avoid the
    # O(B^2*P) mostly-zero operand DMA.
    p_per_img = pool_ref.shape[1] // pool_ref.shape[0]
    pooled = jnp.dot(pool_ref[...], h,
                     preferred_element_type=_F32) * (1.0 / p_per_img)
    emb = jnp.dot(pooled.astype(bf16), w_vproj_ref[...],
                  preferred_element_type=_F32) + b_vproj_ref[...]
    img_f = _l2_normalize_f32(emb)
    img_feat_ref[...] = img_f

    # ------------------------------ text tower ------------------------------
    t = jnp.dot(txt_ref[...], w_tmlp_ref[...],
                preferred_element_type=_F32) + b_tmlp_ref[...]
    t = _quick_gelu(t).astype(bf16)
    temb = jnp.dot(t, w_tproj_ref[...],
                   preferred_element_type=_F32) + b_tproj_ref[...]
    txt_f = _l2_normalize_f32(temb)
    txt_feat_ref[...] = txt_f

    # -------------------------------- logits --------------------------------
    # Text features zero-padded to a lane-dense T_PAD in VMEM scratch (never
    # touches HBM); contract on D on both sides so no transpose materializes;
    # exp(logit_scale) applied on the tiny f32 accumulator.
    t_actual = txt_ref.shape[0]
    txt_pad_ref[...] = jnp.zeros_like(txt_pad_ref)
    txt_pad_ref[0:t_actual, :] = txt_f.astype(txt_pad_ref.dtype)
    logits = jax.lax.dot_general(
        img_f.astype(bf16), txt_pad_ref[...],
        dimension_numbers=(((1,), (1,)), ((), ())),
        preferred_element_type=_F32)
    logits_ref[...] = logits * scale_ref[0, 0]


# ------------------------------ pallas_call glue ----------------------------

_VMEM = pl.BlockSpec(memory_space=pltpu.MemorySpace.VMEM)
_SMEM = pl.BlockSpec(memory_space=pltpu.MemorySpace.SMEM)


def clip_fused_call(params, scale_exp, patches_pad, patch_w_pad, pool_mat,
                    txt_eot, t_pad):
    B = pool_mat.shape[0]
    T = txt_eot.shape[0]
    D = params.vis_proj_w.shape[1]
    return pl.pallas_call(
        _fused_clip_kernel,
        out_shape=(jax.ShapeDtypeStruct((B, D), _F32),      # image features
                   jax.ShapeDtypeStruct((T, D), _F32),      # text features
                   jax.ShapeDtypeStruct((B, t_pad), _F32)), # lane-dense logits
        in_specs=[_SMEM] + [_VMEM] * 13,
        out_specs=(_VMEM, _VMEM, _VMEM),
        scratch_shapes=[pltpu.VMEM((t_pad, D), jnp.bfloat16)],
    )(scale_exp.reshape(1, 1).astype(_F32),
      patches_pad, patch_w_pad, params.patch_b,
      params.vis_mlp_w, params.vis_mlp_b, pool_mat,
      params.vis_proj_w, params.vis_proj_b,
      txt_eot, params.txt_mlp_w, params.txt_mlp_b,
      params.txt_proj_w, params.txt_proj_b)


# ----------------------------- synthetic model ------------------------------

class SyntheticCLIPParams:
    """Deterministic tiny-CLIP parameters (ViT-ish shapes, bf16 weights)."""

    def __init__(self, key, *, channels, patch, vision_width, vocab, ctx,
                 text_width, embed_dim, compute_dtype=jnp.bfloat16):
        ks = jax.random.split(key, 8)
        patch_dim = channels * patch * patch
        s = lambda k, shp, scale: (jax.random.normal(k, shp, _F32)
                                   * scale).astype(compute_dtype)
        # vision tower (bf16 weights feed the MXU; f32 biases a la autocast)
        self.patch_w = s(ks[0], (patch_dim, vision_width), 0.02)
        self.patch_b = jnp.zeros((1, vision_width), _F32)
        self.vis_mlp_w = s(ks[1], (vision_width, vision_width), 0.02)
        self.vis_mlp_b = jnp.zeros((1, vision_width), _F32)
        self.vis_proj_w = s(ks[2], (vision_width, embed_dim), 0.02)
        self.vis_proj_b = jnp.zeros((1, embed_dim), _F32)
        # text tower
        self.tok_emb = s(ks[3], (vocab, text_width), 0.02)
        self.pos_emb = s(ks[4], (ctx, text_width), 0.01)
        self.txt_mlp_w = s(ks[5], (text_width, text_width), 0.02)
        self.txt_mlp_b = jnp.zeros((1, text_width), _F32)
        self.txt_proj_w = s(ks[6], (text_width, embed_dim), 0.02)
        self.txt_proj_b = jnp.zeros((1, embed_dim), _F32)
        # contrastive temperature (CLIP init: ln(1/0.07))
        self.logit_scale = jnp.asarray(jnp.log(1.0 / 0.07), _F32)
        self.patch = patch
        self.compute_dtype = compute_dtype


def extract_patches_nchw(image, patch):
    """NCHW [B,C,H,W] -> [B*P, C*patch*patch] (layout glue, no compute)."""
    B, C, H, W = image.shape
    gh, gw = H // patch, W // patch
    x = image.reshape(B, C, gh, patch, gw, patch)
    x = jnp.transpose(x, (0, 2, 4, 1, 3, 5))          # [B, gh, gw, C, ph, pw]
    return x.reshape(B * gh * gw, C * patch * patch), gh * gw


def make_pool_matrix(B, P, dtype):
    """Exact 0/1 block-diagonal [B, B*P] sum map (1/P applied in-kernel, f32)."""
    return jnp.repeat(jnp.eye(B, dtype=_F32), P, axis=1).astype(dtype)


def gather_eot_embeddings(params, text_ids):
    """Token + positional embedding at the EOT token only.

    The per-token MLP is row-wise, so gathering the EOT row first is exactly
    equivalent to running the MLP on all tokens and gathering afterwards.
    """
    T = text_ids.shape[0]
    eot = jnp.argmax(text_ids, axis=-1)
    tok = jnp.take(params.tok_emb, text_ids[jnp.arange(T), eot], axis=0)
    pos = jnp.take(params.pos_emb, eot, axis=0)
    return (tok + pos).astype(params.compute_dtype)


def openclip_wrapper_forward(params, image, text_ids):
    """Equivalent of OpenClipWrapper.forward -> self.model(image, text)."""
    B = image.shape[0]
    # mimic autocast: bf16 activations / weights, f32 accumulation & epilogues
    patches, P = extract_patches_nchw(image.astype(params.compute_dtype),
                                      params.patch)
    # pad K (patch_dim) to a 128 multiple -> lane-dense, aligned MXU K tile.
    # (weight pad is a closure constant under jit -> constant-folded)
    patch_dim = patches.shape[1]
    k_pad = _round_up(patch_dim, 128)
    patches_pad = jnp.pad(patches, ((0, 0), (0, k_pad - patch_dim)))
    patch_w_pad = jnp.pad(params.patch_w, ((0, k_pad - patch_dim), (0, 0)))

    pool_mat = make_pool_matrix(B, P, params.compute_dtype)
    scale_exp = jnp.exp(params.logit_scale)

    txt_eot = gather_eot_embeddings(params, text_ids)
    T = txt_eot.shape[0]
    t_pad = _round_up(T, 128)   # lane-dense logits store

    img_feats, txt_feats, logits_pad = clip_fused_call(
        params, scale_exp, patches_pad, patch_w_pad, pool_mat, txt_eot, t_pad)
    return img_feats, txt_feats, logits_pad[:, :T]


# ---------------------------------- main ------------------------------------

if __name__ == "__main__":
    key = jax.random.PRNGKey(0)
    k_param, k_img, k_txt = jax.random.split(key, 3)

    B, C, H, W = 2, 3, 16, 16
    PATCH = 8
    VOCAB, CTX = 32, 8
    # EMBED padded to 128 so projection / normalize / logits outputs are
    # lane-dense (no masked partial stores on the lane axis).
    VISION_W, TEXT_W, EMBED = 128, 128, 128

    params = SyntheticCLIPParams(
        k_param, channels=C, patch=PATCH, vision_width=VISION_W,
        vocab=VOCAB, ctx=CTX, text_width=TEXT_W, embed_dim=EMBED)

    image = jax.random.normal(k_img, (B, C, H, W), jnp.float32)   # NCHW
    text = jax.random.randint(k_txt, (B, CTX), 0, VOCAB, jnp.int32)

    # jit the whole forward: host glue + the single fused pallas_call compile
    # into one program (params close over as constants).
    fwd = jax.jit(lambda img, txt: openclip_wrapper_forward(params, img, txt))

    img_feats, txt_feats, logits = jax.block_until_ready(fwd(image, text))

    assert img_feats.shape == (B, EMBED)
    assert txt_feats.shape == (B, EMBED)
    assert logits.shape == (B, B)
    # features are L2-normalized
    assert jnp.allclose(jnp.linalg.norm(img_feats, axis=-1), 1.0, atol=1e-3)
    assert jnp.allclose(jnp.linalg.norm(txt_feats, axis=-1), 1.0, atol=1e-3)
    # logits == exp(logit_scale) * img @ txt.T (scale applied to the f32
    # accumulator; only the bf16 feature cast inside the matmul differs)
    ref_logits = jnp.exp(params.logit_scale) * (img_feats @ txt_feats.T)
    assert jnp.allclose(logits, ref_logits, atol=0.1, rtol=0.05)

    print("KERNEL_OK")
</pallas_src>

<mosaic_0001>
module attributes {stable_mosaic.version = 11 : i64} {
  func.func @_fused_clip_kernel(%arg0: memref<1x1xf32, #tpu.memory_space<smem>>, %arg1: memref<8x256xbf16, #tpu.memory_space<vmem>>, %arg2: memref<256x128xbf16, #tpu.memory_space<vmem>>, %arg3: memref<1x128xf32, #tpu.memory_space<vmem>>, %arg4: memref<128x128xbf16, #tpu.memory_space<vmem>>, %arg5: memref<1x128xf32, #tpu.memory_space<vmem>>, %arg6: memref<2x8xbf16, #tpu.memory_space<vmem>>, %arg7: memref<128x128xbf16, #tpu.memory_space<vmem>>, %arg8: memref<1x128xf32, #tpu.memory_space<vmem>>, %arg9: memref<2x128xbf16, #tpu.memory_space<vmem>>, %arg10: memref<128x128xbf16, #tpu.memory_space<vmem>>, %arg11: memref<1x128xf32, #tpu.memory_space<vmem>>, %arg12: memref<128x128xbf16, #tpu.memory_space<vmem>>, %arg13: memref<1x128xf32, #tpu.memory_space<vmem>>, %arg14: memref<2x128xf32, #tpu.memory_space<vmem>>, %arg15: memref<2x128xf32, #tpu.memory_space<vmem>>, %arg16: memref<2x128xf32, #tpu.memory_space<vmem>>, %arg17: memref<128x128xbf16, #tpu.memory_space<vmem>>) attributes {dimension_semantics = [], scalar_prefetch = 0 : i64, scratch_operands = 1 : i64, tpu.core_type = #tpu.core_type<tc>} {
    %c0 = arith.constant 0 : index
    %c0_0 = arith.constant 0 : index
    %0 = vector.load %arg1[%c0, %c0_0] : memref<8x256xbf16, #tpu.memory_space<vmem>>, vector<8x256xbf16>
    %c0_1 = arith.constant 0 : index
    %c0_2 = arith.constant 0 : index
    %1 = vector.load %arg2[%c0_1, %c0_2] : memref<256x128xbf16, #tpu.memory_space<vmem>>, vector<256x128xbf16>
    %cst = arith.constant dense<0.000000e+00> : vector<8x128xf32>
    %2 = tpu.matmul %0, %1, %cst {dimension_numbers = #tpu.dot_dimension_numbers<[1], [0], [0], [1], [0, 0, 1, 1], [], []>} : vector<8x256xbf16>, vector<256x128xbf16>, vector<8x128xf32> -> vector<8x128xf32>
    %c0_3 = arith.constant 0 : index
    %c0_4 = arith.constant 0 : index
    %3 = vector.load %arg3[%c0_3, %c0_4] : memref<1x128xf32, #tpu.memory_space<vmem>>, vector<1x128xf32>
    %4 = vector.broadcast %3 : vector<1x128xf32> to vector<8x128xf32>
    %5 = arith.addf %2, %4 : vector<8x128xf32>
    %6 = arith.truncf %5 : vector<8x128xf32> to vector<8x128xbf16>
    %c0_5 = arith.constant 0 : index
    %c0_6 = arith.constant 0 : index
    %7 = vector.load %arg4[%c0_5, %c0_6] : memref<128x128xbf16, #tpu.memory_space<vmem>>, vector<128x128xbf16>
    %cst_7 = arith.constant dense<0.000000e+00> : vector<8x128xf32>
    %8 = tpu.matmul %6, %7, %cst_7 {dimension_numbers = #tpu.dot_dimension_numbers<[1], [0], [0], [1], [0, 0, 1, 1], [], []>} : vector<8x128xbf16>, vector<128x128xbf16>, vector<8x128xf32> -> vector<8x128xf32>
    %c0_8 = arith.constant 0 : index
    %c0_9 = arith.constant 0 : index
    %9 = vector.load %arg5[%c0_8, %c0_9] : memref<1x128xf32, #tpu.memory_space<vmem>>, vector<1x128xf32>
    %10 = vector.broadcast %9 : vector<1x128xf32> to vector<8x128xf32>
    %11 = arith.addf %8, %10 : vector<8x128xf32>
    %cst_10 = arith.constant 1.702000e+00 : f32
    %12 = vector.broadcast %cst_10 : f32 to vector<8x128xf32>
    %13 = arith.mulf %12, %11 : vector<8x128xf32>
    %14 = arith.negf %13 : vector<8x128xf32>
    %15 = math.exp %14 : vector<8x128xf32>
    %cst_11 = arith.constant 1.000000e+00 : f32
    %16 = vector.broadcast %cst_11 : f32 to vector<8x128xf32>
    %17 = arith.addf %16, %15 : vector<8x128xf32>
    %18 = arith.divf %16, %17 : vector<8x128xf32>
    %19 = arith.mulf %11, %18 : vector<8x128xf32>
    %20 = arith.truncf %19 : vector<8x128xf32> to vector<8x128xbf16>
    %c0_12 = arith.constant 0 : index
    %c0_13 = arith.constant 0 : index
    %21 = vector.load %arg6[%c0_12, %c0_13] : memref<2x8xbf16, #tpu.memory_space<vmem>>, vector<2x8xbf16>
    %cst_14 = arith.constant dense<0.000000e+00> : vector<2x128xf32>
    %22 = tpu.matmul %21, %20, %cst_14 {dimension_numbers = #tpu.dot_dimension_numbers<[1], [0], [0], [1], [0, 0, 1, 1], [], []>} : vector<2x8xbf16>, vector<8x128xbf16>, vector<2x128xf32> -> vector<2x128xf32>
    %cst_15 = arith.constant 2.500000e-01 : f32
    %23 = vector.broadcast %cst_15 : f32 to vector<2x128xf32>
    %24 = arith.mulf %22, %23 : vector<2x128xf32>
    %25 = arith.truncf %24 : vector<2x128xf32> to vector<2x128xbf16>
    %c0_16 = arith.constant 0 : index
    %c0_17 = arith.constant 0 : index
    %26 = vector.load %arg7[%c0_16, %c0_17] : memref<128x128xbf16, #tpu.memory_space<vmem>>, vector<128x128xbf16>
    %cst_18 = arith.constant dense<0.000000e+00> : vector<2x128xf32>
    %27 = tpu.matmul %25, %26, %cst_18 {dimension_numbers = #tpu.dot_dimension_numbers<[1], [0], [0], [1], [0, 0, 1, 1], [], []>} : vector<2x128xbf16>, vector<128x128xbf16>, vector<2x128xf32> -> vector<2x128xf32>
    %c0_19 = arith.constant 0 : index
    %c0_20 = arith.constant 0 : index
    %28 = vector.load %arg8[%c0_19, %c0_20] : memref<1x128xf32, #tpu.memory_space<vmem>>, vector<1x128xf32>
    %29 = vector.broadcast %28 : vector<1x128xf32> to vector<2x128xf32>
    %30 = arith.addf %27, %29 : vector<2x128xf32>
    %31 = arith.mulf %30, %30 : vector<2x128xf32>
    %cst_21 = arith.constant dense<0.000000e+00> : vector<2xf32>
    %32 = vector.multi_reduction <add>, %31, %cst_21 [1] : vector<2x128xf32> to vector<2xf32>
    %33 = vector.shape_cast %32 : vector<2xf32> to vector<2x1xf32>
    %cst_22 = arith.constant 9.99999996E-13 : f32
    %34 = vector.broadcast %cst_22 : f32 to vector<2x1xf32>
    %35 = arith.addf %33, %34 : vector<2x1xf32>
    %36 = math.rsqrt %35 : vector<2x1xf32>
    %37 = vector.broadcast %36 : vector<2x1xf32> to vector<2x128xf32>
    %38 = arith.mulf %30, %37 : vector<2x128xf32>
    %c0_23 = arith.constant 0 : index
    %c0_24 = arith.constant 0 : index
    %39 = vector.load %arg14[%c0_23, %c0_24] : memref<2x128xf32, #tpu.memory_space<vmem>>, vector<2x128xf32>
    tpu.vector_store %arg14[%c0_23, %c0_24], %38 {strides = array<i32>} : memref<2x128xf32, #tpu.memory_space<vmem>>, vector<2x128xf32>,
    %c0_25 = arith.constant 0 : index
    %c0_26 = arith.constant 0 : index
    %40 = vector.load %arg9[%c0_25, %c0_26] : memref<2x128xbf16, #tpu.memory_space<vmem>>, vector<2x128xbf16>
    %c0_27 = arith.constant 0 : index
    %c0_28 = arith.constant 0 : index
    %41 = vector.load %arg10[%c0_27, %c0_28] : memref<128x128xbf16, #tpu.memory_space<vmem>>, vector<128x128xbf16>
    %cst_29 = arith.constant dense<0.000000e+00> : vector<2x128xf32>
    %42 = tpu.matmul %40, %41, %cst_29 {dimension_numbers = #tpu.dot_dimension_numbers<[1], [0], [0], [1], [0, 0, 1, 1], [], []>} : vector<2x128xbf16>, vector<128x128xbf16>, vector<2x128xf32> -> vector<2x128xf32>
    %c0_30 = arith.constant 0 : index
    %c0_31 = arith.constant 0 : index
    %43 = vector.load %arg11[%c0_30, %c0_31] : memref<1x128xf32, #tpu.memory_space<vmem>>, vector<1x128xf32>
    %44 = vector.broadcast %43 : vector<1x128xf32> to vector<2x128xf32>
    %45 = arith.addf %42, %44 : vector<2x128xf32>
    %cst_32 = arith.constant 1.702000e+00 : f32
    %46 = vector.broadcast %cst_32 : f32 to vector<2x128xf32>
    %47 = arith.mulf %46, %45 : vector<2x128xf32>
    %48 = arith.negf %47 : vector<2x128xf32>
    %49 = math.exp %48 : vector<2x128xf32>
    %cst_33 = arith.constant 1.000000e+00 : f32
    %50 = vector.broadcast %cst_33 : f32 to vector<2x128xf32>
    %51 = arith.addf %50, %49 : vector<2x128xf32>
    %52 = arith.divf %50, %51 : vector<2x128xf32>
    %53 = arith.mulf %45, %52 : vector<2x128xf32>
    %54 = arith.truncf %53 : vector<2x128xf32> to vector<2x128xbf16>
    %c0_34 = arith.constant 0 : index
    %c0_35 = arith.constant 0 : index
    %55 = vector.load %arg12[%c0_34, %c0_35] : memref<128x128xbf16, #tpu.memory_space<vmem>>, vector<128x128xbf16>
    %cst_36 = arith.constant dense<0.000000e+00> : vector<2x128xf32>
    %56 = tpu.matmul %54, %55, %cst_36 {dimension_numbers = #tpu.dot_dimension_numbers<[1], [0], [0], [1], [0, 0, 1, 1], [], []>} : vector<2x128xbf16>, vector<128x128xbf16>, vector<2x128xf32> -> vector<2x128xf32>
    %c0_37 = arith.constant 0 : index
    %c0_38 = arith.constant 0 : index
    %57 = vector.load %arg13[%c0_37, %c0_38] : memref<1x128xf32, #tpu.memory_space<vmem>>, vector<1x128xf32>
    %58 = vector.broadcast %57 : vector<1x128xf32> to vector<2x128xf32>
    %59 = arith.addf %56, %58 : vector<2x128xf32>
    %60 = arith.mulf %59, %59 : vector<2x128xf32>
    %cst_39 = arith.constant dense<0.000000e+00> : vector<2xf32>
    %61 = vector.multi_reduction <add>, %60, %cst_39 [1] : vector<2x128xf32> to vector<2xf32>
    %62 = vector.shape_cast %61 : vector<2xf32> to vector<2x1xf32>
    %cst_40 = arith.constant 9.99999996E-13 : f32
    %63 = vector.broadcast %cst_40 : f32 to vector<2x1xf32>
    %64 = arith.addf %62, %63 : vector<2x1xf32>
    %65 = math.rsqrt %64 : vector<2x1xf32>
    %66 = vector.broadcast %65 : vector<2x1xf32> to vector<2x128xf32>
    %67 = arith.mulf %59, %66 : vector<2x128xf32>
    %c0_41 = arith.constant 0 : index
    %c0_42 = arith.constant 0 : index
    %68 = vector.load %arg15[%c0_41, %c0_42] : memref<2x128xf32, #tpu.memory_space<vmem>>, vector<2x128xf32>
    tpu.vector_store %arg15[%c0_41, %c0_42], %67 {strides = array<i32>} : memref<2x128xf32, #tpu.memory_space<vmem>>, vector<2x128xf32>,
    %cst_43 = arith.constant 0.000000e+00 : bf16
    %69 = vector.broadcast %cst_43 : bf16 to vector<128x128xbf16>
    %c0_44 = arith.constant 0 : index
    %c0_45 = arith.constant 0 : index
    %70 = vector.load %arg17[%c0_44, %c0_45] : memref<128x128xbf16, #tpu.memory_space<vmem>>, vector<128x128xbf16>
    tpu.vector_store %arg17[%c0_44, %c0_45], %69 {strides = array<i32>} : memref<128x128xbf16, #tpu.memory_space<vmem>>, vector<128x128xbf16>,
    %71 = arith.truncf %67 : vector<2x128xf32> to vector<2x128xbf16>
    %c0_46 = arith.constant 0 : index
    %c0_47 = arith.constant 0 : index
    %72 = vector.load %arg17[%c0_46, %c0_47] : memref<128x128xbf16, #tpu.memory_space<vmem>>, vector<2x128xbf16>
    tpu.vector_store %arg17[%c0_46, %c0_47], %71 {strides = array<i32>} : memref<128x128xbf16, #tpu.memory_space<vmem>>, vector<2x128xbf16>,
    %73 = arith.truncf %38 : vector<2x128xf32> to vector<2x128xbf16>
    %c0_48 = arith.constant 0 : index
    %c0_49 = arith.constant 0 : index
    %74 = vector.load %arg17[%c0_48, %c0_49] : memref<128x128xbf16, #tpu.memory_space<vmem>>, vector<128x128xbf16>
    %cst_50 = arith.constant dense<0.000000e+00> : vector<2x128xf32>
    %75 = tpu.matmul %73, %74, %cst_50 {dimension_numbers = #tpu.dot_dimension_numbers<[1], [1], [0], [0], [0, 0, 1, 0], [], []>} : vector<2x128xbf16>, vector<128x128xbf16>, vector<2x128xf32> -> vector<2x128xf32>
    %c0_51 = arith.constant 0 : index
    %c0_52 = arith.constant 0 : index
    %76 = memref.load %arg0[%c0_51, %c0_52] : memref<1x1xf32, #tpu.memory_space<smem>>
    %77 = vector.broadcast %76 : f32 to vector<2x128xf32>
    %78 = arith.mulf %75, %77 : vector<2x128xf32>
    %c0_53 = arith.constant 0 : index
    %c0_54 = arith.constant 0 : index
    %79 = vector.load %arg16[%c0_53, %c0_54] : memref<2x128xf32, #tpu.memory_space<vmem>>, vector<2x128xf32>
    tpu.vector_store %arg16[%c0_53, %c0_54], %78 {strides = array<i32>} : memref<2x128xf32, #tpu.memory_space<vmem>>, vector<2x128xf32>,
    return
  }
}

</mosaic_0001>

<bundles_post_ra>
// kernel: _lambda_.1
= control target key start
LH: loop header
LB: loop body
LE: loop exit
PB: predicated region body
PF: predicated region fallthrough
CT: control target
= control target key end

     0   :  { %s1447_s0 = inlined_call_operand.<no memory space> [shape: f32[1,1], index: 0, kind: input, shape index: {}]   ;;  %s1448_s1 = inlined_call_operand.vmem [shape: bf16[8,256], index: 1, kind: input, shape index: {}]   ;;  %s1449_s2 = inlined_call_operand.vmem [shape: bf16[256,128], index: 2, kind: input, shape index: {}]   ;;  %s1450_s3 = inlined_call_operand.vmem [shape: f32[1,128], index: 3, kind: input, shape index: {}, may-alias: {3,5,8,11,13}]   ;;  %s1451_s4 = inlined_call_operand.vmem [shape: bf16[128,128], index: 4, kind: input, shape index: {}]   ;;  %s1452_s5 = inlined_call_operand.vmem [shape: f32[1,128], index: 5, kind: input, shape index: {}, may-alias: {3,5,8,11,13}]   ;;  %s1453_s6 = inlined_call_operand.vmem [shape: bf16[2,8], index: 6, kind: input, shape index: {}]   ;;  %s1454_s7 = inlined_call_operand.vmem [shape: bf16[128,128], index: 7, kind: input, shape index: {}]   ;;  %s1455_s8 = inlined_call_operand.vmem [shape: f32[1,128], index: 8, kind: input, shape index: {}, may-alias: {3,5,8,11,13}]   ;;  %s1456_s9 = inlined_call_operand.vmem [shape: bf16[2,128], index: 9, kind: input, shape index: {}]   ;;  %s1457_s10 = inlined_call_operand.vmem [shape: bf16[128,128], index: 10, kind: input, shape index: {}]   ;;  %s1458_s11 = inlined_call_operand.vmem [shape: f32[1,128], index: 11, kind: input, shape index: {}, may-alias: {3,5,8,11,13}]   ;;  %s1459_s12 = inlined_call_operand.vmem [shape: bf16[128,128], index: 12, kind: input, shape index: {}]   ;;  %s1460_s13 = inlined_call_operand.vmem [shape: f32[1,128], index: 13, kind: input, shape index: {}, may-alias: {3,5,8,11,13}]   ;;  %s1461_s14 = inlined_call_operand.hbm [shape: f32[2,128], index: 14, kind: output, shape index: {0}]   ;;  %s1462_s15 = inlined_call_operand.hbm [shape: f32[2,128], index: 15, kind: output, shape index: {1}]   ;;  %s1463_s16 = inlined_call_operand.hbm [shape: f32[2,128], index: 16, kind: output, shape index: {2}]  }
   0x1   :  { %1464 = sst [smem:[#allocation11_spill]] %s1447_s0 }
   0x2   :  { %23 = vsyncpa [#allocation5], 0  ;;  %v1030_v0 = vld [vmem:[%s1449_s2 + $0x38] sm:$0xff]  ;;  %v1029_v2 = vld [vmem:[%s1449_s2 + $0x30] sm:$0xff] }
   0x3   :  { %v1038_v1 = vld [vmem:[%s1449_s2 + $0x78] sm:$0xff]  ;;  %194 = vmatpush.bf16.msra.mxu0 %v1030_v0  ;;  %v1037_v3 = vld [vmem:[%s1449_s2 + $0x70] sm:$0xff]  ;;  %v1028_v4 = vld [vmem:[%s1449_s2 + $0x28] sm:$0xff] }
   0x4   :  { %207 = vmatpush.bf16.msra.mxu1 %v1038_v1  ;;  %v1036_v5 = vld [vmem:[%s1449_s2 + $0x68] sm:$0xff] }
   0x7   :  { %195 = vmatpush.bf16.msra.mxu0 %v1029_v2 }
   0x8   :  { %208 = vmatpush.bf16.msra.mxu1 %v1037_v3 }
   0x9   :  { %24 = vsyncpa [#allocation7], 0  ;;  %v1027_v6 = vld [vmem:[%s1449_s2 + $0x20] sm:$0xff]  ;;  %v1026_v8 = vld [vmem:[%s1449_s2 + $0x18] sm:$0xff]  ;;  %vm329_vm8 = vcmask 1043456   ;;  %vm325_vm9 = vcmask 64512  }
   0xa   :  { %v1035_v7 = vld [vmem:[%s1449_s2 + $0x60] sm:$0xff]  ;;  %v1034_v9 = vld [vmem:[%s1449_s2 + $0x58] sm:$0xff]  ;;  %v1025_v10 = vld [vmem:[%s1449_s2 + $0x10] sm:$0xff]  ;;  %vm430_vm10 = vcmask 1041408   ;;  %s767_s23 = sshll.u32 %s1462_s15, 4  ;;  %s1178_s25 = smov [#allocation4]   ;;  %s768_s23 = int_to_ptr.hbm [resolvable:$true] %s767_s23 }
   0xb   :  { %196 = vmatpush.bf16.msra.mxu0 %v1028_v4  ;;  %v1033_v11 = vld [vmem:[%s1449_s2 + $0x50] sm:$0xff]  ;;  %v1046_v12 = vld [vmem:[%s1451_s4 + $0x38] sm:$0xff]  ;;  %v1024_v13 = vld [vmem:[%s1449_s2 + $0x8] sm:$0xff]  ;;  %s754_s26 = sshll.u32 %s1178_s25, 4  ;;  %s1179_s27 = smov [#allocation8]   ;;  %s755_s26 = int_to_ptr.vmem [resolvable:$true] %s754_s26 }
   0xc   :  { %209 = vmatpush.bf16.msra.mxu1 %v1036_v5  ;;  %289 = vmatpush.bf16.msra.mxu3 %v1046_v12  ;;  %v1032_v14 = vld [vmem:[%s1449_s2 + $0x48] sm:$0xff]  ;;  %v54_v15 = vld [vmem:[%s1448_s1] sm:$0xff]  ;;  %v1045_v16 = vld [vmem:[%s1451_s4 + $0x30] sm:$0xff]  ;;  %s776_s28 = sshll.u32 %s1179_s27, 4  ;;  %s777_s28 = int_to_ptr.vmem [resolvable:$true] %s776_s28 }
   0xd   :  { %v92_v17 = vunpack.c.l.b16 %v54_v15  ;;  %v93_v18 = vunpack.c.h.b16 %v54_v15  ;;  %v1023_v19 = vld [vmem:[%s1449_s2] sm:$0xff]  ;;  %v1062_v21 = vld [vmem:[%s1457_s10 + $0x38] sm:$0xff]  ;;  %v1044_v22 = vld [vmem:[%s1451_s4 + $0x28] sm:$0xff] }
   0xe   :  { %v1031_v20 = vld [vmem:[%s1449_s2 + $0x40] sm:$0xff]  ;;  %v1061_v26 = vld [vmem:[%s1457_s10 + $0x30] sm:$0xff]  ;;  %v1042_v27 = vld [vmem:[%s1451_s4 + $0x18] sm:$0xff] }
   0xf   :  { %197 = vmatpush.bf16.msra.mxu0 %v1027_v6  ;;  %v94_v23 = vpack.c.b16 %v92_v17, %v92_v17  ;;  %v95_v24 = vpack.c.b16 %v93_v18, %v93_v18  ;;  %v1043_v25 = vld [vmem:[%s1451_s4 + $0x20] sm:$0xff]  ;;  %v1060_v28 = vld [vmem:[%s1457_s10 + $0x28] sm:$0xff]  ;;  %v1041_v29 = vld [vmem:[%s1451_s4 + $0x10] sm:$0xff] }
  0x10   :  { %210 = vmatpush.bf16.msra.mxu1 %v1035_v7  ;;  %290 = vmatpush.bf16.msra.mxu3 %v1045_v16  ;;  %v1059_v30 = vld [vmem:[%s1457_s10 + $0x20] sm:$0xff]  ;;  %v1058_v31 = vld [vmem:[%s1457_s10 + $0x18] sm:$0xff]  ;;  %v1057_v32 = vld [vmem:[%s1457_s10 + $0x10] sm:$0xff] }
  0x11   :  { %v1056_v33 = vld [vmem:[%s1457_s10 + $0x8] sm:$0xff]  ;;  %v1055_v34 = vld [vmem:[%s1457_s10] sm:$0xff]  ;;  %v1070_v47 = vld [vmem:[%s1459_s12 + $0x38] sm:$0xff] }
  0x12   :  { %v447_v35 = vld [vmem:[%s1456_s9] sm:$0x1]  ;;  %v1040_v36 = vld [vmem:[%s1451_s4 + $0x8] sm:$0xff]  ;;  %v1069_v48 = vld [vmem:[%s1459_s12 + $0x30] sm:$0xff] }
  0x13   :  { %198 = vmatpush.bf16.msra.mxu0 %v1026_v8  ;;  %v1039_v37 = vld [vmem:[%s1451_s4] sm:$0xff]  ;;  %v1068_v51 = vld [vmem:[%s1459_s12 + $0x28] sm:$0xff]  ;;  %v1066_v55 = vld [vmem:[%s1459_s12 + $0x18] sm:$0xff]  ;;  %s1465_s4 = sld [smem:[#allocation11_spill]] }
  0x14   :  { %211 = vmatpush.bf16.msra.mxu1 %v1034_v9  ;;  %291 = vmatpush.bf16.msra.mxu3 %v1044_v22  ;;  %v1083_v38 = vld [vmem:[%s1450_s3] ss:$0 sm:$0xff]  ;;  %v1065_v57 = vld [vmem:[%s1459_s12 + $0x10] sm:$0xff]  ;;  %v1064_v6 = vld [vmem:[%s1459_s12 + $0x8] sm:$0xff] }
  0x15   :  { %v1084_v49 = vld [vmem:[%s1458_s11] ss:$0 sm:$0xff] }
  0x16   :  { %v1067_v53 = vld [vmem:[%s1459_s12 + $0x20] sm:$0xff] }
  0x17   :  { %199 = vmatpush.bf16.msra.mxu0 %v1025_v10  ;;  %v1063_v8 = vld [vmem:[%s1459_s12] sm:$0xff]  ;;  %s756_s12 = sshll.u32 %s1461_s14, 4  ;;  %s757_s12 = int_to_ptr.hbm [resolvable:$true] %s756_s12 }
  0x18   :  { %212 = vmatpush.bf16.msra.mxu1 %v1033_v11  ;;  %292 = vmatpush.bf16.msra.mxu3 %v1043_v25  ;;  %v1085_v10 = vld [vmem:[%s1452_s5] ss:$0 sm:$0xff] }
  0x1b   :  { %200 = vmatpush.bf16.msra.mxu0 %v1024_v13 }
  0x1c   :  { %213 = vmatpush.bf16.msra.mxu1 %v1032_v14  ;;  %293 = vmatpush.bf16.msra.mxu3 %v1042_v27 }
  0x1f   :  { %201 = vmatpush.bf16.msra.mxu0 %v1023_v19 }
  0x20   :  { %214 = vmatpush.bf16.msra.mxu1 %v1031_v20  ;;  %294 = vmatpush.bf16.msra.mxu3 %v1041_v29 }
  0x22   :  { %202 = vmatmul.bf16.vlgmr.msra.gmra.mxu0 %v94_v23 }
  0x23   :  { %516 = vmatpush.bf16.msrb.mxu0 %v1062_v21  ;;  %215 = vmatmul.bf16.vlgmr.msra.gmra.mxu1 %v95_v24 }
  0x24   :  { %295 = vmatpush.bf16.msra.mxu3 %v1040_v36  ;;  %619 = vmatpush.bf16.msrb.mxu1 %v1070_v47  ;;  %v1050_v36 = vld [vmem:[%s1454_s7 + $0x18] sm:$0xff] }
  0x27   :  { %517 = vmatpush.bf16.msrb.mxu0 %v1061_v26 }
  0x28   :  { %296 = vmatpush.bf16.msra.mxu3 %v1039_v37  ;;  %620 = vmatpush.bf16.msrb.mxu1 %v1069_v48  ;;  %v1049_v37 = vld [vmem:[%s1454_s7 + $0x10] sm:$0xff] }
  0x2b   :  { %518 = vmatpush.bf16.msrb.mxu0 %v1060_v28 }
  0x2c   :  { %621 = vmatpush.bf16.msrb.mxu1 %v1068_v51 }
  0x2f   :  { %519 = vmatpush.bf16.msrb.mxu0 %v1059_v30 }
  0x30   :  { %622 = vmatpush.bf16.msrb.mxu1 %v1067_v53 }
  0x33   :  { %520 = vmatpush.bf16.msrb.mxu0 %v1058_v31  ;;  %v324_v31 = vld [vmem:[%s1453_s6] sm:$0x1]  ;;  %s778_s6 = sshll.u32 %s1463_s16, 4  ;;  %s779_s6 = int_to_ptr.hbm [resolvable:$true] %s778_s6 }
  0x34   :  { %623 = vmatpush.bf16.msrb.mxu1 %v1066_v55 }
  0x37   :  { %521 = vmatpush.bf16.msrb.mxu0 %v1057_v32  ;;  %v1054_v32 = vld [vmem:[%s1454_s7 + $0x38] sm:$0xff] }
  0x38   :  { %624 = vmatpush.bf16.msrb.mxu1 %v1065_v57 }
  0x3b   :  { %522 = vmatpush.bf16.msrb.mxu0 %v1056_v33  ;;  %v1053_v33 = vld [vmem:[%s1454_s7 + $0x30] sm:$0xff] }
  0x3c   :  { %625 = vmatpush.bf16.msrb.mxu1 %v1064_v6  ;;  %v1087_v6 = vld [vmem:[%s1455_s8] ss:$0 sm:$0xff]  ;;  %s1177_s8 = smov [#allocation6]  }
  0x3d   :  { %s765_s20 = sshll.u32 %s1177_s8, 4  ;;  %s766_s20 = int_to_ptr.vmem [resolvable:$true] %s765_s20 }
  0x3f   :  { %523 = vmatpush.bf16.msrb.mxu0 %v1055_v34  ;;  %v1052_v34 = vld [vmem:[%s1454_s7 + $0x28] sm:$0xff] }
  0x40   :  { %626 = vmatpush.bf16.msrb.mxu1 %v1063_v8 }
  0x42   :  { %524 = vmatmul.bf16.vlgmr.msrb.gmra.mxu0 %v447_v35  ;;  %v1051_v35 = vld [vmem:[%s1454_s7 + $0x20] sm:$0xff] }
  0x9f   :  { %v203_v39 = vpop.f32.mrf.mxu0 }
  0xa0   :  { %v216_v40 = vpop.f32.mrf.mxu1  ;;  %v204_v41 = vadd.f32 %v1083_v38, %v203_v39  ;;  %v1048_v38 = vld [vmem:[%s1454_s7 + $0x8] sm:$0xff]  ;;  %v1086_v39 = vld [vmem:[%s1460_s13] ss:$0 sm:$0xff] }
  0xa2   :  { %v217_v42 = vadd.f32 %v216_v40, %v204_v41 }
  0xa4   :  { %v220_v43 = vpack.c.bf16 %v217_v42, %v217_v42 }
  0xa6   :  { %297 = vmatmul.bf16.vlgmr.msra.gmra.mxu3 %v220_v43 }
  0xa7   :  { %v205_v44 = vpop.f32.mrf.mxu0 }
  0xa8   :  { %v218_v45 = vpop.f32.mrf.mxu1 }
  0xa9   :  { %v1047_v45 = vld [vmem:[%s1454_s7] sm:$0xff] }
  0xbf   :  { %v525_v46 = vpop.f32.mrf.mxu0 }
  0xc0   :  { %v526_v52 = vadd.f32 %v1084_v49, %v525_v46  ;;  %v1176_v46 = vmov 0  }
  0xc1   :  { %663 = vst [vmem:[#allocation2 + $0x38] sm:$0xf] %v1176_v46 }
  0xc2   :  { %v958_v54 = vmul.f32 -1.702, %v526_v52  ;;  %664 = vst [vmem:[#allocation2 + $0x3c] sm:$0xf] %v1176_v46 }
  0xc3   :  { %649 = vst [vmem:[#allocation2] sm:$0xf] %v1176_v46 }
  0xc4   :  { %v531_v56 = vmul.f32 1.442695, %v958_v54  ;;  %650 = vst [vmem:[#allocation2 + $0x4] sm:$0xf] %v1176_v46 }
  0xc5   :  { %651 = vst [vmem:[#allocation2 + $0x8] sm:$0xf] %v1176_v46 }
  0xc6   :  { %1088 = vpow2.f32 %v531_v56  ;;  %652 = vst [vmem:[#allocation2 + $0xc] sm:$0xf] %v1176_v46 }
  0xc7   :  { %v527_v50 = vpop.f32.mrf.mxu0  ;;  %653 = vst [vmem:[#allocation2 + $0x10] sm:$0xf] %v1176_v46 }
  0xc8   :  { %654 = vst [vmem:[#allocation2 + $0x14] sm:$0xf] %v1176_v46 }
  0xc9   :  { %v1078_v47 = vld [vmem:[#allocation2 + $0x38] sm:$0xff]  ;;  %655 = vst [vmem:[#allocation2 + $0x18] sm:$0xf] %v1176_v46 }
  0xca   :  { %656 = vst [vmem:[#allocation2 + $0x1c] sm:$0xf] %v1176_v46  ;;  %732 = vmatpush.bf16.xpose.msra.mxu2 %v1078_v47 }
  0xcb   :  { %657 = vst [vmem:[#allocation2 + $0x20] sm:$0xf] %v1176_v46 }
  0xcc   :  { %v1089_v58 = vpop.eup %1088  ;;  %658 = vst [vmem:[#allocation2 + $0x24] sm:$0xf] %v1176_v46 }
  0xcd   :  { %v533_v59 = vadd.f32 1.0, %v1089_v58  ;;  %659 = vst [vmem:[#allocation2 + $0x28] sm:$0xf] %v1176_v46 }
  0xce   :  { %660 = vst [vmem:[#allocation2 + $0x2c] sm:$0xf] %v1176_v46 }
  0xcf   :  { %1090 = vrcp.f32 %v533_v59  ;;  %vm539_vm0 = vweird.f32 %v533_v59  ;;  %v545_v0 = vand.u32 2147483648, %v533_v59  ;;  %v543_v2 = vand.u32 2147483647, %v533_v59  ;;  %661 = vst [vmem:[#allocation2 + $0x30] sm:$0xf] %v1176_v46  ;;  %v1073_v58 = vld [vmem:[#allocation2 + $0x10] sm:$0xff] }
  0xd0   :  { %662 = vst [vmem:[#allocation2 + $0x34] sm:$0xf] %v1176_v46 }
  0xd1   :  { %v546_v3 = vor.u32 1.1754944e-38, %v545_v0  ;;  %vm544_vm3 = vcmp.eq.f32.partialorder %v543_v2, 8.507059e+37  ;;  %v1074_v55 = vld [vmem:[#allocation2 + $0x18] sm:$0xff] }
  0xd3   :  { %v1075_v54 = vld [vmem:[#allocation2 + $0x20] sm:$0xff] }
  0xd5   :  { %v1091_v60 = vpop.eup %1090 }
  0xd6   :  { %v535_v61 = vmul.f32 %v1091_v60, %v533_v59  ;;  %vm540_vm1 = vweird.f32 %v1091_v60 }
  0xd7   :  { %vm541_vm2 = vmor %vm539_vm0, %vm540_vm1  ;;  %v1077_v48 = vld [vmem:[#allocation2 + $0x30] sm:$0xff] }
  0xd8   :  { %v536_v62 = vsub.f32 1.0, %v535_v61  ;;  %733 = vmatpush.bf16.xpose.msra.mxu2 %v1077_v48 }
  0xda   :  { %v537_v63 = vmul.f32 %v1091_v60, %v536_v62 }
  0xdc   :  { %v538_v1 = vadd.f32 %v1091_v60, %v537_v63  ;;  %v1072_v63 = vld [vmem:[#allocation2 + $0x8] sm:$0xff] }
  0xde   :  { %v542_v4 = vsel %vm541_vm2, %v1091_v60, %v538_v1 }
  0xdf   :  { %v547_v5 = vsel %vm544_vm3, %v546_v3, %v542_v4 }
  0xe0   :  { %v549_v7 = vmul.f32 %v547_v5, %v526_v52  ;;  %v1076_v52 = vld [vmem:[#allocation2 + $0x28] sm:$0xff] }
  0xe1   :  { %734 = vmatpush.bf16.xpose.msra.mxu2 %v1076_v52 }
  0xe2   :  { %v550_v9 = vpack.c.bf16 %v549_v7, %v549_v7 }
  0xe4   :  { %627 = vmatmul.bf16.vlgmr.msrb.gmra.mxu1 %v550_v9 }
  0xe9   :  { %735 = vmatpush.bf16.xpose.msra.mxu2 %v1075_v54 }
  0xf1   :  { %736 = vmatpush.bf16.xpose.msra.mxu2 %v1074_v55 }
  0xf9   :  { %737 = vmatpush.bf16.xpose.msra.mxu2 %v1073_v58 }
 0x101   :  { %738 = vmatpush.bf16.xpose.msra.mxu2 %v1072_v63 }
 0x129   :  { %v298_v11 = vpop.f32.mrf.mxu3 }
 0x12a   :  { %v299_v12 = vadd.f32 %v1085_v10, %v298_v11 }
 0x12c   :  { %v892_v13 = vmul.f32 -1.702, %v299_v12 }
 0x12e   :  { %v304_v14 = vmul.f32 1.442695, %v892_v13 }
 0x130   :  { %1092 = vpow2.f32 %v304_v14 }
 0x131   :  { %v300_v15 = vpop.f32.mrf.mxu3 }
 0x136   :  { %v1093_v16 = vpop.eup %1092 }
 0x137   :  { %v306_v17 = vadd.f32 1.0, %v1093_v16 }
 0x139   :  { %1094 = vrcp.f32 %v306_v17  ;;  %v318_v21 = vand.u32 2147483648, %v306_v17  ;;  %v316_v23 = vand.u32 2147483647, %v306_v17  ;;  %vm312_vm5 = vweird.f32 %v306_v17 }
 0x13b   :  { %v319_v25 = vor.u32 1.1754944e-38, %v318_v21  ;;  %vm317_vm7 = vcmp.eq.f32.partialorder %v316_v23, 8.507059e+37  ;;  %v746_v23 = vstv %s1465_s4 }
 0x13f   :  { %v1095_v18 = vpop.eup %1094 }
 0x140   :  { %v308_v19 = vmul.f32 %v1095_v18, %v306_v17  ;;  %vm313_vm4 = vweird.f32 %v1095_v18 }
 0x141   :  { %vm314_vm6 = vmor %vm312_vm5, %vm313_vm4 }
 0x142   :  { %v309_v20 = vsub.f32 1.0, %v308_v19 }
 0x144   :  { %v310_v22 = vmul.f32 %v1095_v18, %v309_v20 }
 0x146   :  { %v311_v24 = vadd.f32 %v1095_v18, %v310_v22 }
 0x148   :  { %v315_v26 = vsel %vm314_vm6, %v1095_v18, %v311_v24 }
 0x149   :  { %v320_v27 = vsel %vm317_vm7, %v319_v25, %v315_v26 }
 0x14a   :  { %v322_v28 = vmul.f32 %v320_v27, %v299_v12 }
 0x14c   :  { %v323_v29 = vpack.c.bf16 %v322_v28, %v322_v28 }
 0x14e   :  { %v331_v30 = vsel %vm329_vm8, %v323_v29, 0 }
 0x14f   :  { %340 = vmatpush.bf16.msrb.mxu3 %v331_v30 }
 0x152   :  { %893 = vmatmul.msk.bf16.vlgmr.msrb.gmra.mxu3 %vm325_vm9, %v324_v31 }
 0x153   :  { %416 = vmatpush.bf16.msra.mxu3 %v1054_v32 }
 0x157   :  { %417 = vmatpush.bf16.msra.mxu3 %v1053_v33 }
 0x15b   :  { %418 = vmatpush.bf16.msra.mxu3 %v1052_v34 }
 0x15f   :  { %419 = vmatpush.bf16.msra.mxu3 %v1051_v35 }
 0x161   :  { %v628_v40 = vpop.f32.mrf.mxu1 }
 0x162   :  { %v629_v41 = vadd.f32 %v1086_v39, %v628_v40 }
 0x163   :  { %420 = vmatpush.bf16.msra.mxu3 %v1050_v36 }
 0x164   :  { %v632_v42 = vmul.f32 %v629_v41, %v629_v41 }
 0x166   :  { %v633_v43 = vsel %vm430_vm10, %v632_v42, 0.0 }
 0x167   :  { %421 = vmatpush.bf16.msra.mxu3 %v1049_v37  ;;  %634 = vadd.xlane.f32.xlu0 %v633_v43 }
 0x169   :  { %v630_v44 = vpop.f32.mrf.mxu1 }
 0x16b   :  { %422 = vmatpush.bf16.msra.mxu3 %v1048_v38 }
 0x16f   :  { %423 = vmatpush.bf16.msra.mxu3 %v1047_v45 }
 0x1d5   :  { %v342_v49 = vpop.f32.mrf.mxu3 }
 0x1d6   :  { %v346_v50 = vmul.f32 0.25, %v342_v49 }
 0x1d8   :  { %v347_v51 = vpack.c.bf16 %v346_v50, %v346_v50 }
 0x1da   :  { %424 = vmatmul.bf16.vlgmr.msra.gmra.mxu3 %v347_v51  ;;  %v635_v56 = vpop.xlane.xlu0 %634 }
 0x1db   :  { %v636_v57 = vadd.f32 1e-12, %v635_v56 }
 0x1dd   :  { %v344_v53 = vpop.f32.mrf.mxu3  ;;  %1096 = vrsqrt.f32 %v636_v57  ;;  %vm643_vm11 = vweird.f32 %v636_v57 }
 0x1e3   :  { %v1097_v59 = vpop.eup %1096 }
 0x1e4   :  { %v638_v60 = vmul.f32 %v1097_v59, %v636_v57  ;;  %vm644_vm12 = vweird.f32 %v1097_v59 }
 0x1e5   :  { %vm645_vm13 = vmor %vm643_vm11, %vm644_vm12 }
 0x1e6   :  { %v639_v61 = vmul.f32 %v1097_v59, %v638_v60 }
 0x1e8   :  { %v640_v62 = vmul.f32 0.5, %v639_v61 }
 0x1ea   :  { %v641_v0 = vsub.f32 1.5, %v640_v62 }
 0x1ec   :  { %v642_v1 = vmul.f32 %v1097_v59, %v641_v0 }
 0x1ee   :  { %v646_v2 = vsel %vm645_vm13, %v1097_v59, %v642_v1 }
 0x1ef   :  { %v647_v3 = vmul.f32 %v646_v2, %v629_v41 }
 0x1f1   :  { %v665_v4 = vpack.c.bf16 %v647_v3, %v647_v3  ;;  %648 = vst [vmem:[#allocation6] sm:$0x3] %v647_v3 }
 0x1f2   :  { %770 = dma.vmem_to_hbm [thread:$0]  %s766_s20, 32, %s768_s23, [#allocation7]  }
 0x1f3   :  { %666 = vst [vmem:[#allocation2] sm:$0x1] %v665_v4 }
 0x1fa   :  { %v1071_v5 = vld [vmem:[#allocation2] sm:$0xff] }
 0x1fb   :  { %739 = vmatpush.bf16.xpose.msra.mxu2 %v1071_v5 }
 0x25d   :  { %v425_v7 = vpop.f32.mrf.mxu3 }
 0x25e   :  { %v426_v8 = vadd.f32 %v1087_v6, %v425_v7 }
 0x260   :  { %v429_v9 = vmul.f32 %v426_v8, %v426_v8 }
 0x262   :  { %v431_v10 = vsel %vm430_vm10, %v429_v9, 0.0 }
 0x263   :  { %432 = vadd.xlane.f32.xlu0 %v431_v10 }
 0x265   :  { %v427_v11 = vpop.f32.mrf.mxu3 }
 0x2d6   :  { %v433_v12 = vpop.xlane.xlu0 %432 }
 0x2d7   :  { %v434_v13 = vadd.f32 1e-12, %v433_v12 }
 0x2d9   :  { %1098 = vrsqrt.f32 %v434_v13  ;;  %vm441_vm15 = vweird.f32 %v434_v13 }
 0x2df   :  { %v1099_v14 = vpop.eup %1098 }
 0x2e0   :  { %v436_v15 = vmul.f32 %v1099_v14, %v434_v13  ;;  %vm442_vm14 = vweird.f32 %v1099_v14 }
 0x2e1   :  { %vm443_vm0 = vmor %vm441_vm15, %vm442_vm14 }
 0x2e2   :  { %v437_v16 = vmul.f32 %v1099_v14, %v436_v15 }
 0x2e4   :  { %v438_v17 = vmul.f32 0.5, %v437_v16 }
 0x2e6   :  { %v439_v18 = vsub.f32 1.5, %v438_v17 }
 0x2e8   :  { %v440_v19 = vmul.f32 %v1099_v14, %v439_v18 }
 0x2ea   :  { %v444_v20 = vsel %vm443_vm0, %v1099_v14, %v440_v19 }
 0x2eb   :  { %v445_v21 = vmul.f32 %v444_v20, %v426_v8 }
 0x2ed   :  { %v667_v22 = vpack.c.bf16 %v445_v21, %v445_v21  ;;  %446 = vst [vmem:[#allocation4] sm:$0x3] %v445_v21 }
 0x2ee   :  { %759 = dma.vmem_to_hbm [thread:$0]  %s755_s26, 32, %s757_s12, [#allocation5]  }
 0x2ef   :  { %740 = vmatmul.bf16.vlgmr.msra.gmra.mxu2 %v667_v22 }
 0x372   :  { %v741_v24 = vpop.f32.mrf.mxu2 }
 0x373   :  { %v747_v25 = vmul.f32 %v746_v23, %v741_v24 }
 0x375   :  { %748 = vst [vmem:[#allocation8] sm:$0x3] %v747_v25 }
 0x376   :  { %781 = dma.vmem_to_hbm [thread:$0]  %s777_s28, 32, %s779_s6, [#allocation7]  }
 0x37a   :  { %v743_v26 = vpop.f32.mrf.mxu2 }
 0x37b   :  { %1172 = dma.done.wait [#allocation5], 32  }
 0x37c   :  { %1173 = vsyncadd [#allocation5], 4294967264 }
 0x37d   :  { %1174 = dma.done.wait [#allocation7], 64  }
 0x37e   :  { %1175 = vsyncadd [#allocation7], 4294967232 }
 0x37f   :  { %794 = vsyncpa [#allocation5], 1 }
 0x380   :  { %795 = vsyncpa [#allocation7], 1 }

</bundles_post_ra>
